<compile_context>
chip_gen: v7x
topology: tpu7x:2x2x1
jax: 0.10.0
libtpu: 0.0.40
codegen_flags: <defaults>
</compile_context>

<pallas_src>
import jax
import jax.numpy as jnp
import numpy as np
from jax.experimental import pallas as pl
from jax.experimental.pallas import tpu as pltpu

LANE = 128
IN_FEATURES = 28 * 28  # 784


def mlp_kernel(x_ref, w1_ref, b1_ref, w2_ref, b2_ref, w3_ref, b3_ref, o_ref):
    # Cast the f32 input tile to the weight dtype (bf16) in-kernel (free vs DMA).
    x = x_ref[...].astype(w1_ref.dtype)
    # Layer 1: (TB,784)bf16 @ (784,128)bf16 -> f32 acc; bias + ReLU in f32.
    h1 = jnp.dot(x, w1_ref[...], preferred_element_type=jnp.float32)
    h1 = jnp.maximum(h1 + b1_ref[...], 0.0).astype(w2_ref.dtype)
    # Layer 2: (TB,128) @ (128,128) -> f32 acc; bias + ReLU in f32.
    h2 = jnp.dot(h1, w2_ref[...], preferred_element_type=jnp.float32)
    h2 = jnp.maximum(h2 + b2_ref[...], 0.0).astype(w3_ref.dtype)
    # Final layer: (TB,128) @ (128,128) -> f32 acc; bias only, lane-dense bf16 store.
    out = jnp.dot(h2, w3_ref[...], preferred_element_type=jnp.float32)
    o_ref[...] = (out + b3_ref[...]).astype(o_ref.dtype)


def _pad_to(a, shape):
    return jnp.pad(a, [(0, s - d) for d, s in zip(a.shape, shape)])


def _round_up(n, m):
    return ((n + m - 1) // m) * m


def net_forward(x, params, *, tb=1024, compute_dtype=jnp.bfloat16):
    """x: (B, 1, 28, 28) or (B, 784) float32. Returns (B, 10) float32."""
    x2d = x.reshape(-1, IN_FEATURES)  # mirrors x.view(-1, 28*28); stays f32
    B = x2d.shape[0]
    w1, b1, w2, b2, w3, b3 = params

    # Zero-pad all feature dims to 128 lanes (padded lanes stay exactly 0 through
    # ReLU + zero weight rows).  Weights are tiny; this cost is negligible.
    w1p = _pad_to(w1, (IN_FEATURES, LANE)).astype(compute_dtype)
    w2p = _pad_to(w2, (LANE, LANE)).astype(compute_dtype)
    w3p = _pad_to(w3, (LANE, LANE)).astype(compute_dtype)
    b1p = _pad_to(b1, (1, LANE)).astype(jnp.float32)
    b2p = _pad_to(b2, (1, LANE)).astype(jnp.float32)
    b3p = _pad_to(b3, (1, LANE)).astype(jnp.float32)

    # Batch tile: large to amortize the ~0.35us per-grid-step overhead, but
    # capped at ceil(B/2) (rounded to 16) so >=2 grid steps exist once B is
    # large enough -> the "parallel" batch axis can shard over v7x's 2 cores.
    half_b = _round_up(max((B + 1) // 2, 1), 16)
    TB = max(16, min(tb, half_b))
    grid = (pl.cdiv(B, TB),)  # ragged last tile: no batch padding in HBM

    const = lambda i: (0, 0)  # weights/biases resident across grid steps
    out = pl.pallas_call(
        mlp_kernel,
        out_shape=jax.ShapeDtypeStruct((B, LANE), jnp.bfloat16),
        grid_spec=pltpu.PrefetchScalarGridSpec(
            num_scalar_prefetch=0,
            grid=grid,
            in_specs=[
                pl.BlockSpec((TB, IN_FEATURES), lambda i: (i, 0)),
                pl.BlockSpec((IN_FEATURES, LANE), const),
                pl.BlockSpec((1, LANE), const),
                pl.BlockSpec((LANE, LANE), const),
                pl.BlockSpec((1, LANE), const),
                pl.BlockSpec((LANE, LANE), const),
                pl.BlockSpec((1, LANE), const),
            ],
            out_specs=pl.BlockSpec((TB, LANE), lambda i: (i, 0)),
        ),
        compiler_params=pltpu.CompilerParams(
            dimension_semantics=("parallel",),
            vmem_limit_bytes=32 * 1024 * 1024,
        ),
    )(x2d, w1p, b1p, w2p, b2p, w3p, b3p)

    return out[:B, :10].astype(jnp.float32)


def init_params(key):
    """Deterministic synthetic init mimicking nn.Linear's U(-1/sqrt(fan_in), +)."""
    dims = [(IN_FEATURES, 100), (100, 50), (50, 10)]
    params = []
    for i, (fan_in, fan_out) in enumerate(dims):
        kw, kb = jax.random.split(jax.random.fold_in(key, i))
        bound = 1.0 / np.sqrt(fan_in)
        # stored as (in, out) so the kernel computes x @ W (== x @ W_pt.T)
        w = jax.random.uniform(kw, (fan_in, fan_out), jnp.float32, -bound, bound)
        b = jax.random.uniform(kb, (1, fan_out), jnp.float32, -bound, bound)
        params += [w, b]
    return tuple(params)


def reference_forward(x, params, compute_dtype=jnp.bfloat16):
    """Pure-JAX reference with the same bf16-in / f32-accumulate / bf16-out recipe."""
    x2d = x.reshape(-1, IN_FEATURES).astype(compute_dtype)
    w1, b1, w2, b2, w3, b3 = params
    h1 = jnp.dot(x2d, w1.astype(compute_dtype),
                 preferred_element_type=jnp.float32) + b1
    h1 = jnp.maximum(h1, 0.0).astype(compute_dtype)
    h2 = jnp.dot(h1, w2.astype(compute_dtype),
                 preferred_element_type=jnp.float32) + b2
    h2 = jnp.maximum(h2, 0.0).astype(compute_dtype)
    out = jnp.dot(h2, w3.astype(compute_dtype),
                  preferred_element_type=jnp.float32) + b3
    # Mirror the kernel's bf16 output store.
    return out.astype(jnp.bfloat16).astype(jnp.float32)


if __name__ == "__main__":
    key = jax.random.PRNGKey(0)
    kx, kp = jax.random.split(key)
    # Small MNIST-like batch: (B=8, C=1, H=28, W=28)
    x = jax.random.normal(kx, (8, 1, 28, 28), jnp.float32)
    params = init_params(kp)

    out = net_forward(x, params)
    out = jax.block_until_ready(out)

    ref = reference_forward(x, params)
    np.testing.assert_allclose(np.asarray(out), np.asarray(ref),
                               rtol=1e-2, atol=1e-2)
    assert out.shape == (8, 10)
    print("KERNEL_OK")
</pallas_src>

<mosaic_0001>
module attributes {stable_mosaic.version = 11 : i64} {
  func.func @mlp_kernel(%arg0: i32, %arg1: memref<16x784xf32, #tpu.memory_space<vmem>>, %arg2: memref<784x128xbf16, #tpu.memory_space<vmem>>, %arg3: memref<1x128xf32, #tpu.memory_space<vmem>>, %arg4: memref<128x128xbf16, #tpu.memory_space<vmem>>, %arg5: memref<1x128xf32, #tpu.memory_space<vmem>>, %arg6: memref<128x128xbf16, #tpu.memory_space<vmem>>, %arg7: memref<1x128xf32, #tpu.memory_space<vmem>>, %arg8: memref<16x128xbf16, #tpu.memory_space<vmem>>) attributes {dimension_semantics = [#tpu.dimension_semantics<parallel>], iteration_bounds = array<i64: 1>, scalar_prefetch = 0 : i64, scratch_operands = 0 : i64, tpu.core_type = #tpu.core_type<tc>, window_params = [{transform_indices = @transform_0, window_bounds = array<i64: 16, 784>}, {pipeline_mode = #tpu.pipeline_mode<synchronous>, transform_indices = @transform_1, window_bounds = array<i64: 784, 128>}, {pipeline_mode = #tpu.pipeline_mode<synchronous>, transform_indices = @transform_2, window_bounds = array<i64: 1, 128>}, {pipeline_mode = #tpu.pipeline_mode<synchronous>, transform_indices = @transform_3, window_bounds = array<i64: 128, 128>}, {pipeline_mode = #tpu.pipeline_mode<synchronous>, transform_indices = @transform_4, window_bounds = array<i64: 1, 128>}, {pipeline_mode = #tpu.pipeline_mode<synchronous>, transform_indices = @transform_5, window_bounds = array<i64: 128, 128>}, {pipeline_mode = #tpu.pipeline_mode<synchronous>, transform_indices = @transform_6, window_bounds = array<i64: 1, 128>}, {transform_indices = @transform_7, window_bounds = array<i64: 16, 128>}]} {
    %c0 = arith.constant 0 : index
    %c0_0 = arith.constant 0 : index
    %0 = vector.load %arg1[%c0, %c0_0] : memref<16x784xf32, #tpu.memory_space<vmem>>, vector<16x784xf32>
    %1 = arith.truncf %0 : vector<16x784xf32> to vector<16x784xbf16>
    %c0_1 = arith.constant 0 : index
    %c0_2 = arith.constant 0 : index
    %2 = vector.load %arg2[%c0_1, %c0_2] : memref<784x128xbf16, #tpu.memory_space<vmem>>, vector<784x128xbf16>
    %cst = arith.constant dense<0.000000e+00> : vector<16x128xf32>
    %3 = tpu.matmul %1, %2, %cst {dimension_numbers = #tpu.dot_dimension_numbers<[1], [0], [0], [1], [0, 0, 1, 1], [], []>} : vector<16x784xbf16>, vector<784x128xbf16>, vector<16x128xf32> -> vector<16x128xf32>
    %c0_3 = arith.constant 0 : index
    %c0_4 = arith.constant 0 : index
    %4 = vector.load %arg3[%c0_3, %c0_4] : memref<1x128xf32, #tpu.memory_space<vmem>>, vector<1x128xf32>
    %5 = vector.broadcast %4 : vector<1x128xf32> to vector<16x128xf32>
    %6 = arith.addf %3, %5 : vector<16x128xf32>
    %cst_5 = arith.constant 0.000000e+00 : f32
    %7 = vector.broadcast %cst_5 : f32 to vector<16x128xf32>
    %8 = arith.maximumf %6, %7 : vector<16x128xf32>
    %9 = arith.truncf %8 : vector<16x128xf32> to vector<16x128xbf16>
    %c0_6 = arith.constant 0 : index
    %c0_7 = arith.constant 0 : index
    %10 = vector.load %arg4[%c0_6, %c0_7] : memref<128x128xbf16, #tpu.memory_space<vmem>>, vector<128x128xbf16>
    %cst_8 = arith.constant dense<0.000000e+00> : vector<16x128xf32>
    %11 = tpu.matmul %9, %10, %cst_8 {dimension_numbers = #tpu.dot_dimension_numbers<[1], [0], [0], [1], [0, 0, 1, 1], [], []>} : vector<16x128xbf16>, vector<128x128xbf16>, vector<16x128xf32> -> vector<16x128xf32>
    %c0_9 = arith.constant 0 : index
    %c0_10 = arith.constant 0 : index
    %12 = vector.load %arg5[%c0_9, %c0_10] : memref<1x128xf32, #tpu.memory_space<vmem>>, vector<1x128xf32>
    %13 = vector.broadcast %12 : vector<1x128xf32> to vector<16x128xf32>
    %14 = arith.addf %11, %13 : vector<16x128xf32>
    %cst_11 = arith.constant 0.000000e+00 : f32
    %15 = vector.broadcast %cst_11 : f32 to vector<16x128xf32>
    %16 = arith.maximumf %14, %15 : vector<16x128xf32>
    %17 = arith.truncf %16 : vector<16x128xf32> to vector<16x128xbf16>
    %c0_12 = arith.constant 0 : index
    %c0_13 = arith.constant 0 : index
    %18 = vector.load %arg6[%c0_12, %c0_13] : memref<128x128xbf16, #tpu.memory_space<vmem>>, vector<128x128xbf16>
    %cst_14 = arith.constant dense<0.000000e+00> : vector<16x128xf32>
    %19 = tpu.matmul %17, %18, %cst_14 {dimension_numbers = #tpu.dot_dimension_numbers<[1], [0], [0], [1], [0, 0, 1, 1], [], []>} : vector<16x128xbf16>, vector<128x128xbf16>, vector<16x128xf32> -> vector<16x128xf32>
    %c0_15 = arith.constant 0 : index
    %c0_16 = arith.constant 0 : index
    %20 = vector.load %arg7[%c0_15, %c0_16] : memref<1x128xf32, #tpu.memory_space<vmem>>, vector<1x128xf32>
    %21 = vector.broadcast %20 : vector<1x128xf32> to vector<16x128xf32>
    %22 = arith.addf %19, %21 : vector<16x128xf32>
    %23 = arith.truncf %22 : vector<16x128xf32> to vector<16x128xbf16>
    %c0_17 = arith.constant 0 : index
    %c0_18 = arith.constant 0 : index
    %24 = vector.load %arg8[%c0_17, %c0_18] : memref<16x128xbf16, #tpu.memory_space<vmem>>, vector<16x128xbf16>
    tpu.vector_store %arg8[%c0_17, %c0_18], %23 {strides = array<i32>} : memref<16x128xbf16, #tpu.memory_space<vmem>>, vector<16x128xbf16>,
    return
  }
  func.func @transform_0(%arg0: i32) -> (i32, i32) {
    %c0_i32 = arith.constant 0 : i32
    %c0_i32_0 = arith.constant 0 : i32
    return %arg0, %c0_i32 : i32, i32
  }
  func.func @transform_1(%arg0: i32) -> (i32, i32) {
    %c0_i32 = arith.constant 0 : i32
    %c0_i32_0 = arith.constant 0 : i32
    %c0_i32_1 = arith.constant 0 : i32
    return %c0_i32, %c0_i32_0 : i32, i32
  }
  func.func @transform_2(%arg0: i32) -> (i32, i32) {
    %c0_i32 = arith.constant 0 : i32
    %c0_i32_0 = arith.constant 0 : i32
    %c0_i32_1 = arith.constant 0 : i32
    return %c0_i32, %c0_i32_0 : i32, i32
  }
  func.func @transform_3(%arg0: i32) -> (i32, i32) {
    %c0_i32 = arith.constant 0 : i32
    %c0_i32_0 = arith.constant 0 : i32
    %c0_i32_1 = arith.constant 0 : i32
    return %c0_i32, %c0_i32_0 : i32, i32
  }
  func.func @transform_4(%arg0: i32) -> (i32, i32) {
    %c0_i32 = arith.constant 0 : i32
    %c0_i32_0 = arith.constant 0 : i32
    %c0_i32_1 = arith.constant 0 : i32
    return %c0_i32, %c0_i32_0 : i32, i32
  }
  func.func @transform_5(%arg0: i32) -> (i32, i32) {
    %c0_i32 = arith.constant 0 : i32
    %c0_i32_0 = arith.constant 0 : i32
    %c0_i32_1 = arith.constant 0 : i32
    return %c0_i32, %c0_i32_0 : i32, i32
  }
  func.func @transform_6(%arg0: i32) -> (i32, i32) {
    %c0_i32 = arith.constant 0 : i32
    %c0_i32_0 = arith.constant 0 : i32
    %c0_i32_1 = arith.constant 0 : i32
    return %c0_i32, %c0_i32_0 : i32, i32
  }
  func.func @transform_7(%arg0: i32) -> (i32, i32) {
    %c0_i32 = arith.constant 0 : i32
    %c0_i32_0 = arith.constant 0 : i32
    return %arg0, %c0_i32 : i32, i32
  }
}

</mosaic_0001>

<bundles_post_ra>
// kernel: tpu_custom_call.1
= control target key start
LH: loop header
LB: loop body
LE: loop exit
PB: predicated region body
PF: predicated region fallthrough
CT: control target
= control target key end

     0   :  { %12 = vsyncpa [#allocation3], 0  ;;  %s1496_s0 = inlined_call_operand.hbm [shape: f32[8,784], index: 0, kind: input, shape index: {}]   ;;  %s1497_s1 = inlined_call_operand.hbm [shape: bf16[784,128], index: 1, kind: input, shape index: {}]   ;;  %s1498_s2 = inlined_call_operand.vmem [shape: f32[1,128], index: 2, kind: input, shape index: {}]   ;;  %s1499_s3 = inlined_call_operand.hbm [shape: bf16[128,128], index: 3, kind: input, shape index: {}]   ;;  %s1500_s4 = inlined_call_operand.vmem [shape: f32[1,128], index: 4, kind: input, shape index: {}]   ;;  %s1501_s5 = inlined_call_operand.hbm [shape: bf16[128,128], index: 5, kind: input, shape index: {}]   ;;  %s1502_s6 = inlined_call_operand.vmem [shape: f32[1,128], index: 6, kind: input, shape index: {}]   ;;  %s1503_s7 = inlined_call_operand.hbm [shape: bf16[8,128], index: 7, kind: output, shape index: {}]  }
   0x1   :  { %13 = vsyncpa [#allocation6], 0 }
   0x2   :  { %14 = vsyncpa [#allocation9], 0 }
   0x3   :  { %15 = vsyncpa [#allocation4], 0 }
   0x4   :  { %20 = vsyncadd [#allocation3], 896  ;;  %s1334_s24 = smov [#allocation5]   ;;  %s1216_s28 = scalar_lea.hbm %s1497_s1, 6272 }
   0x5   :  { %s33_s25 = sshll.u32 %s1334_s24, 4  ;;  %p1217_p0 = scmp.ne.s32.totalorder %s1497_s1, %s1216_s28  ;;  %s34_s25 = int_to_ptr.vmem [resolvable:$true] %s33_s25 }
   0x6   :  { %p1220_p1 = scmp.lt.u32.totalorder %s1216_s28, %s1497_s1 }
   0x8   :  { %p1222_p2 = pnand %p1220_p1, %p1217_p0 }
   0xa   :  { %1225 = shalt.err (!%p1222_p2)
}
   0xb   :  { %s1226_s10 = scalar_lea.vmem %s34_s25, 6272  ;;  %p1231_p4 = scmp.lt.s32.totalorder %s34_s25, %s34_s25 }
   0xc   :  { %p1227_p3 = scmp.ne.s32.totalorder %s34_s25, %s1226_s10  ;;  %p1232_p5 = scmp.lt.s32.totalorder %s1226_s10, %s1226_s10 }
   0xe   :  { %p1233_p6 = por %p1232_p5, %p1231_p4 }
  0x10   :  { %p1234_p7 = pnand %p1233_p6, %p1227_p3 }
  0x12   :  { %1237 = shalt.err (!%p1234_p7)
}
  0x13   :  { %s1335_s11 = smov 64   ;;  %s1336_s12 = smov 4  }
  0x14   :  { %39 = dma.hbm_to_vmem [thread:$0]  %s1497_s1, 6272, %s34_s25, [#allocation6], %s1335_s11, %s1335_s11, %s1336_s12  }
  0x15   :  { %s1337_s15 = smov [#allocation2]   ;;  %s1238_s19 = scalar_lea.hbm %s1496_s0, 896 }
  0x16   :  { %s21_s16 = sshll.u32 %s1337_s15, 4  ;;  %p1239_p8 = scmp.ne.s32.totalorder %s1496_s0, %s1238_s19  ;;  %s22_s16 = int_to_ptr.vmem [resolvable:$true] %s21_s16 }
  0x17   :  { %p1242_p9 = scmp.lt.u32.totalorder %s1238_s19, %s1496_s0 }
  0x19   :  { %p1244_p10 = pnand %p1242_p9, %p1239_p8 }
  0x1b   :  { %1247 = shalt.err (!%p1244_p10)
}
  0x1c   :  { %s1248_s24 = scalar_lea.vmem %s22_s16, 896  ;;  %s1252_s1 = scalar_lea.vmem %s22_s16, 1792 }
  0x1d   :  { %p1249_p11 = scmp.ne.s32.totalorder %s22_s16, %s1248_s24  ;;  %p1253_p12 = scmp.lt.s32.totalorder %s22_s16, %s22_s16 }
  0x1e   :  { %p1254_p13 = scmp.lt.s32.totalorder %s1252_s1, %s1248_s24 }
  0x20   :  { %p1255_p0 = por %p1254_p13, %p1253_p12 }
  0x22   :  { %p1256_p1 = pnand %p1255_p0, %p1249_p11 }
  0x24   :  { %1259 = shalt.err (!%p1256_p1)
}
  0x25   :  { %s1338_s25 = smov 896   ;;  %s1339_s26 = smov 56  }
  0x26   :  { %27 = dma.hbm_to_vmem [thread:$0]  %s1496_s0, 896, %s22_s16, [#allocation3], %s1338_s25, %s1338_s25, %s1339_s26  }
  0x27   :  { %s1340_s29 = smov [#allocation7]   ;;  %s1341_s8 = smov [#allocation8]  }
  0x28   :  { %s47_s30 = sshll.u32 %s1340_s29, 4  ;;  %s61_s9 = sshll.u32 %s1341_s8, 4  ;;  %s48_s30 = int_to_ptr.vmem [resolvable:$true] %s47_s30  ;;  %s1412_s9 = int_to_ptr.vmem [resolvable:$true] %s61_s9 }
  0x29   :  { %s1260_s14 = scalar_lea.hbm %s1499_s3, 1024 }
  0x2a   :  { %p1261_p2 = scmp.ne.s32.totalorder %s1499_s3, %s1260_s14  ;;  %p1264_p3 = scmp.lt.u32.totalorder %s1260_s14, %s1499_s3 }
  0x2c   :  { %p1266_p4 = pnand %p1264_p3, %p1261_p2 }
  0x2e   :  { %1269 = shalt.err (!%p1266_p4)
}
  0x2f   :  { %s1270_s0 = scalar_lea.vmem %s48_s30, 1024  ;;  %p1275_p6 = scmp.lt.s32.totalorder %s48_s30, %s48_s30 }
  0x30   :  { %p1271_p5 = scmp.ne.s32.totalorder %s48_s30, %s1270_s0  ;;  %p1276_p7 = scmp.lt.s32.totalorder %s1270_s0, %s1270_s0 }
  0x32   :  { %p1277_p8 = por %p1276_p7, %p1275_p6 }
  0x34   :  { %p1278_p9 = pnand %p1277_p8, %p1271_p5 }
  0x36   :  { %1281 = shalt.err (!%p1278_p9)
}
  0x37   :  { %53 = dma.hbm_to_vmem [thread:$0]  %s1499_s3, 1024, %s48_s30, [#allocation6], %s1335_s11, %s1335_s11, %s1336_s12  }
  0x38   :  { %s1282_s23 = scalar_lea.hbm %s1501_s5, 1024 }
  0x39   :  { %p1283_p10 = scmp.ne.s32.totalorder %s1501_s5, %s1282_s23  ;;  %p1286_p11 = scmp.lt.u32.totalorder %s1282_s23, %s1501_s5 }
  0x3b   :  { %p1288_p12 = pnand %p1286_p11, %p1283_p10 }
  0x3d   :  { %1291 = shalt.err (!%p1288_p12)
}
  0x3e   :  { %s1292_s27 = scalar_lea.vmem %s1412_s9, 1024  ;;  %p1297_p0 = scmp.lt.s32.totalorder %s1412_s9, %s1412_s9 }
  0x3f   :  { %p1293_p13 = scmp.ne.s32.totalorder %s1412_s9, %s1292_s27  ;;  %p1298_p1 = scmp.lt.s32.totalorder %s1292_s27, %s1292_s27 }
  0x41   :  { %p1299_p2 = por %p1298_p1, %p1297_p0 }
  0x43   :  { %p1300_p3 = pnand %p1299_p2, %p1293_p13 }
  0x45   :  { %1303 = shalt.err (!%p1300_p3)
}
  0x46   :  { %67 = dma.hbm_to_vmem [thread:$0]  %s1501_s5, 1024, %s1412_s9, [#allocation9], %s1335_s11, %s1335_s11, %s1336_s12  }
  0x47   :  { %1326 = dma.done.wait [#allocation3], 1792  }
  0x48   :  { %1327 = vsyncadd [#allocation3], 4294965504 }
  0x49   :  { %1328 = dma.done.wait [#allocation6], 7296  }
  0x4a   :  { %1329 = vsyncadd [#allocation6], 4294960000 }
  0x4b   :  { %1330 = dma.done.wait [#allocation9], 1024  }
  0x4c   :  { %1331 = vsyncadd [#allocation9], 4294966272  ;;  %v1151_v0 = vld [vmem:[#allocation5 + $0x40] sm:$0xff]   ;;  %v1155_v4 = vld [vmem:[#allocation5 + $0x48] sm:$0xff]   ;;  %v1342_v43 = vmov 0.0   ;;  %vm1343_vm0 = vmmov 0  }
  0x4d   :  { %v1152_v1 = vld [vmem:[#allocation5] sm:$0xff]   ;;  %1008 = vmatprep.subr.bf16.mxu0 %v1151_v0  ;;  %v1156_v5 = vld [vmem:[#allocation5 + $0x8] sm:$0xff]   ;;  %v1159_v8 = vld [vmem:[#allocation5 + $0x50] sm:$0xff]   ;;  %vm503_vm1 = vcmask 130048  }
  0x4e   :  { %v1153_v2 = vld [vmem:[#allocation5 + $0xc0] sm:$0xff]   ;;  %1009 = vmatpush3.bf16.msra.mxu0 %v1152_v1  ;;  %v1157_v6 = vld [vmem:[#allocation5 + $0xc8] sm:$0xff]   ;;  %v1160_v9 = vld [vmem:[#allocation5 + $0x10] sm:$0xff]  }
  0x4f   :  { %v1154_v3 = vld [vmem:[#allocation5 + $0x80] sm:$0xff]   ;;  %1030 = vmatprep.subr.bf16.mxu1 %v1153_v2  ;;  %1010 = vmatprep.subr.bf16.mxu0 %v1155_v4  ;;  %v1158_v7 = vld [vmem:[#allocation5 + $0x88] sm:$0xff]   ;;  %v1161_v10 = vld [vmem:[#allocation5 + $0xd0] sm:$0xff]  }
  0x50   :  { %1031 = vmatpush3.bf16.msra.mxu1 %v1154_v3  ;;  %v1162_v11 = vld [vmem:[#allocation5 + $0x90] sm:$0xff]   ;;  %v1163_v12 = vld [vmem:[#allocation5 + $0x58] sm:$0xff]   ;;  %v1167_v16 = vld [vmem:[#allocation5 + $0x60] sm:$0xff]  }
  0x51   :  { %1032 = vmatprep.subr.bf16.mxu1 %v1157_v6  ;;  %v1164_v13 = vld [vmem:[#allocation5 + $0x18] sm:$0xff]   ;;  %v1168_v17 = vld [vmem:[#allocation5 + $0x20] sm:$0xff]   ;;  %v1171_v20 = vld [vmem:[#allocation5 + $0x68] sm:$0xff]  }
  0x52   :  { %1011 = vmatpush3.bf16.msra.mxu0 %v1156_v5  ;;  %v1165_v14 = vld [vmem:[#allocation5 + $0xd8] sm:$0xff]   ;;  %v1169_v18 = vld [vmem:[#allocation5 + $0xe0] sm:$0xff]   ;;  %v1172_v21 = vld [vmem:[#allocation5 + $0x28] sm:$0xff]  }
  0x53   :  { %1012 = vmatprep.subr.bf16.mxu0 %v1159_v8  ;;  %v1166_v15 = vld [vmem:[#allocation5 + $0x98] sm:$0xff]   ;;  %v1170_v19 = vld [vmem:[#allocation5 + $0xa0] sm:$0xff]   ;;  %v1173_v22 = vld [vmem:[#allocation5 + $0xe8] sm:$0xff]  }
  0x54   :  { %1033 = vmatpush3.bf16.msra.mxu1 %v1158_v7  ;;  %v1174_v23 = vld [vmem:[#allocation5 + $0xa8] sm:$0xff]   ;;  %v1175_v24 = vld [vmem:[#allocation5 + $0x70] sm:$0xff]   ;;  %v1179_v28 = vld [vmem:[#allocation5 + $0x78] sm:$0xff]  }
  0x55   :  { %1034 = vmatprep.subr.bf16.mxu1 %v1161_v10  ;;  %v1176_v25 = vld [vmem:[#allocation5 + $0x30] sm:$0xff]   ;;  %v1180_v29 = vld [vmem:[#allocation5 + $0x38] sm:$0xff]   ;;  %v90_v36 = vld [vmem:[#allocation2 + $0x38] sm:$0xff] }
  0x56   :  { %1013 = vmatpush3.bf16.msra.mxu0 %v1160_v9  ;;  %v1177_v26 = vld [vmem:[#allocation5 + $0xf0] sm:$0xff]   ;;  %v1181_v30 = vld [vmem:[#allocation5 + $0xf8] sm:$0xff]   ;;  %v1183_v38 = vld [vmem:[#allocation5 + $0x140] sm:$0xff]  }
  0x57   :  { %1014 = vmatprep.subr.bf16.mxu0 %v1163_v12  ;;  %v1178_v27 = vld [vmem:[#allocation5 + $0xb0] sm:$0xff]   ;;  %v84_v31 = vld [vmem:[#allocation2 + $0x8] sm:$0xff]  ;;  %v86_v39 = vld [vmem:[#allocation2 + $0x18] sm:$0xff] }
  0x58   :  { %1035 = vmatpush3.bf16.msra.mxu1 %v1162_v11  ;;  %v91_v32 = vld [vmem:[#allocation2 + $0x40] sm:$0xff]  ;;  %v1182_v34 = vld [vmem:[#allocation5 + $0xb8] sm:$0xff]   ;;  %v93_v40 = vld [vmem:[#allocation2 + $0x50] sm:$0xff] }
  0x59   :  { %1036 = vmatprep.subr.bf16.mxu1 %v1165_v14  ;;  %v98_v33 = vpack.c.bf16 %v91_v32, %v84_v31  ;;  %v83_v35 = vld [vmem:[#allocation2] sm:$0xff]  ;;  %v100_v41 = vpack.c.bf16 %v93_v40, %v86_v39  ;;  %v1184_v42 = vld [vmem:[#allocation5 + $0x100] sm:$0xff]   ;;  %v92_v45 = vld [vmem:[#allocation2 + $0x48] sm:$0xff] }
  0x5a   :  { %1015 = vmatpush3.bf16.msra.mxu0 %v1164_v13  ;;  %v97_v37 = vpack.c.bf16 %v90_v36, %v83_v35  ;;  %v85_v44 = vld [vmem:[#allocation2 + $0x10] sm:$0xff]  ;;  %v1185_v47 = vld [vmem:[#allocation5 + $0x148] sm:$0xff]   ;;  %v1187_v49 = vld [vmem:[#allocation5 + $0x150] sm:$0xff]  }
  0x5b   :  { %1016 = vmatprep.subr.bf16.mxu0 %v1167_v16  ;;  %539 = vmatprep.mubr.bf16.mxu0 %v98_v33  ;;  %v99_v46 = vpack.c.bf16 %v92_v45, %v85_v44  ;;  %v1186_v48 = vld [vmem:[#allocation5 + $0x108] sm:$0xff]   ;;  %v1188_v50 = vld [vmem:[#allocation5 + $0x110] sm:$0xff]   ;;  %v1189_v51 = vld [vmem:[#allocation5 + $0x158] sm:$0xff]  }
  0x5c   :  { %1037 = vmatpush3.bf16.msra.mxu1 %v1166_v15  ;;  %580 = vmatprep.mubr.bf16.mxu1 %v100_v41  ;;  %v1190_v52 = vld [vmem:[#allocation5 + $0x118] sm:$0xff]   ;;  %v1191_v53 = vld [vmem:[#allocation5 + $0x160] sm:$0xff]   ;;  %v1193_v55 = vld [vmem:[#allocation5 + $0x168] sm:$0xff]  }
  0x5d   :  { %1038 = vmatprep.subr.bf16.mxu1 %v1169_v18  ;;  %v1192_v54 = vld [vmem:[#allocation5 + $0x120] sm:$0xff]   ;;  %v88_v57 = vld [vmem:[#allocation2 + $0x28] sm:$0xff]  ;;  %v1194_v58 = vld [vmem:[#allocation5 + $0x128] sm:$0xff]  }
  0x5e   :  { %1017 = vmatpush3.bf16.msra.mxu0 %v1168_v17  ;;  %v1199_v56 = vld [vmem:[#allocation5 + $0x180] sm:$0xff]   ;;  %v1195_v59 = vld [vmem:[#allocation5 + $0x170] sm:$0xff]   ;;  %v96_v63 = vld [vmem:[#allocation2 + $0x68] sm:$0xff] }
  0x5f   :  { %1018 = vmatprep.subr.bf16.mxu0 %v1171_v20  ;;  %v95_v60 = vld [vmem:[#allocation2 + $0x60] sm:$0xff]  ;;  %v89_v62 = vld [vmem:[#allocation2 + $0x30] sm:$0xff]  ;;  %v1197_v2 = vld [vmem:[#allocation5 + $0x178] sm:$0xff]  }
  0x60   :  { %1039 = vmatpush3.bf16.msra.mxu1 %v1170_v19  ;;  %v102_v61 = vpack.c.bf16 %v95_v60, %v88_v57  ;;  %v103_v0 = vpack.c.bf16 %v96_v63, %v89_v62  ;;  %v1196_v1 = vld [vmem:[#allocation5 + $0x130] sm:$0xff]   ;;  %v1198_v3 = vld [vmem:[#allocation5 + $0x138] sm:$0xff]   ;;  %v94_v5 = vld [vmem:[#allocation2 + $0x58] sm:$0xff] }
  0x61   :  { %1040 = vmatprep.subr.bf16.mxu1 %v1173_v22  ;;  %v87_v4 = vld [vmem:[#allocation2 + $0x20] sm:$0xff]  ;;  %v1200_v7 = vld [vmem:[#allocation7] sm:$0xff]   ;;  %v1202_v9 = vld [vmem:[#allocation7 + $0x10] sm:$0xff]  }
  0x62   :  { %1019 = vmatpush3.bf16.msra.mxu0 %v1172_v21  ;;  %v101_v6 = vpack.c.bf16 %v94_v5, %v87_v4  ;;  %v1201_v8 = vld [vmem:[#allocation7 + $0x8] sm:$0xff]   ;;  %v1203_v10 = vld [vmem:[#allocation7 + $0x18] sm:$0xff]   ;;  %v1204_v11 = vld [vmem:[#allocation7 + $0x20] sm:$0xff]  }
  0x63   :  { %1020 = vmatprep.subr.bf16.mxu0 %v1175_v24  ;;  %v1205_v12 = vld [vmem:[#allocation7 + $0x28] sm:$0xff]   ;;  %v1206_v13 = vld [vmem:[#allocation7 + $0x30] sm:$0xff]   ;;  %v1207_v14 = vld [vmem:[#allocation7 + $0x38] sm:$0xff]  }
  0x64   :  { %1041 = vmatpush3.bf16.msra.mxu1 %v1174_v23  ;;  %v1208_v15 = vld [vmem:[#allocation8] sm:$0xff]   ;;  %v1209_v16 = vld [vmem:[#allocation8 + $0x8] sm:$0xff]   ;;  %v1210_v17 = vld [vmem:[#allocation8 + $0x10] sm:$0xff]  }
  0x65   :  { %1042 = vmatprep.subr.bf16.mxu1 %v1177_v26  ;;  %v1211_v18 = vld [vmem:[#allocation8 + $0x18] sm:$0xff]   ;;  %v1212_v19 = vld [vmem:[#allocation8 + $0x20] sm:$0xff]   ;;  %v1213_v20 = vld [vmem:[#allocation8 + $0x28] sm:$0xff]  }
  0x66   :  { %1021 = vmatpush3.bf16.msra.mxu0 %v1176_v25  ;;  %v930_v22 = vld [vmem:[%s1498_s2] ss:$0 sm:$0xff]  ;;  %v1215_v57 = vld [vmem:[#allocation8 + $0x38] sm:$0xff]  }
  0x67   :  { %1022 = vmatprep.subr.bf16.mxu0 %v1179_v28 }
  0x68   :  { %1043 = vmatpush3.bf16.msra.mxu1 %v1178_v27 }
  0x69   :  { %1044 = vmatprep.subr.bf16.mxu1 %v1181_v30 }
  0x6a   :  { %1023 = vmatpush3.bf16.msra.mxu0 %v1180_v29 }
  0x6b   :  { %1052 = vmatprep.subr.bf16.mxu0 %v1183_v38 }
  0x6c   :  { %1045 = vmatpush3.bf16.msra.mxu1 %v1182_v34 }
  0x6d   :  { %1094 = vmatprep.subr.bf16.mxu1 %v1342_v43  ;;  %540 = vmatmul.mubr.bf16.vlgmr.msra.gmra.mrb[0].mxu0 %v97_v37 }
  0x6e   :  { %1053 = vmatpush3.bf16.msra.mxu0 %v1184_v42  ;;  %621 = vmatprep.mubr.bf16.mxu0 %v102_v61 }
  0x6f   :  { %581 = vmatmul.mubr.bf16.vlgmr.msra.gmra.mrb[0].mxu1 %v99_v46  ;;  %1054 = vmatprep.subr.bf16.mxu0 %v1185_v47 }
  0x70   :  { %1096 = vmatprep.mubr.msk.bf16.mxu1 %vm1343_vm0, %v1342_v43  ;;  %1095 = vmatpush3.bf16.msra.mxu1 %v1199_v56  ;;  %v1214_v56 = vld [vmem:[#allocation8 + $0x30] sm:$0xff]  }
  0x71   :  { %1100 = vmatprep.subr.bf16.mxu1 %v1342_v43 }
  0x72   :  { %1055 = vmatpush3.bf16.msra.mxu0 %v1186_v48 }
  0x73   :  { %1056 = vmatprep.subr.bf16.mxu0 %v1187_v49 }
  0x76   :  { %1057 = vmatpush3.bf16.msra.mxu0 %v1188_v50 }
  0x77   :  { %1058 = vmatprep.subr.bf16.mxu0 %v1189_v51  ;;  %1097 = vmatmul.mubr.msk.bf16.vlgmr.msra.gmra.mrb[4].mxu1 %vm503_vm1, %v103_v0 }
  0x78   :  { %1116 = vmatprep.mubr.msk.bf16.mxu1 %vm1343_vm0, %v1342_v43  ;;  %1101 = vmatpush3.bf16.msra.mxu1 %v1200_v7 }
  0x79   :  { %1102 = vmatprep.subr.bf16.mxu1 %v1342_v43 }
  0x7a   :  { %1059 = vmatpush3.bf16.msra.mxu0 %v1190_v52 }
  0x7b   :  { %1060 = vmatprep.subr.bf16.mxu0 %v1191_v53 }
  0x7c   :  { %1103 = vmatpush3.bf16.msra.mxu1 %v1201_v8 }
  0x7d   :  { %1104 = vmatprep.subr.bf16.mxu1 %v1342_v43 }
  0x7e   :  { %1061 = vmatpush3.bf16.msra.mxu0 %v1192_v54 }
  0x7f   :  { %1062 = vmatprep.subr.bf16.mxu0 %v1193_v55 }
  0x80   :  { %1105 = vmatpush3.bf16.msra.mxu1 %v1202_v9 }
  0x81   :  { %1106 = vmatprep.subr.bf16.mxu1 %v1342_v43 }
  0x82   :  { %1063 = vmatpush3.bf16.msra.mxu0 %v1194_v58  ;;  %v981_v58 = vld [vmem:[%s1500_s4] ss:$0 sm:$0xff] }
  0x83   :  { %1064 = vmatprep.subr.bf16.mxu0 %v1195_v59 }
  0x84   :  { %1107 = vmatpush3.bf16.msra.mxu1 %v1203_v10 }
  0x85   :  { %1108 = vmatprep.subr.bf16.mxu1 %v1342_v43 }
  0x86   :  { %1065 = vmatpush3.bf16.msra.mxu0 %v1196_v1 }
  0x87   :  { %1066 = vmatprep.subr.bf16.mxu0 %v1197_v2 }
  0x88   :  { %1109 = vmatpush3.bf16.msra.mxu1 %v1204_v11 }
  0x89   :  { %1110 = vmatprep.subr.bf16.mxu1 %v1342_v43 }
  0x8a   :  { %1067 = vmatpush3.bf16.msra.mxu0 %v1198_v3 }
  0x8b   :  { %1120 = vmatprep.subr.bf16.mxu0 %v1342_v43 }
  0x8c   :  { %1111 = vmatpush3.bf16.msra.mxu1 %v1205_v12 }
  0x8d   :  { %622 = vmatmul.mubr.bf16.vlgmr.msra.gmra.mrb[4].mxu0 %v101_v6  ;;  %1112 = vmatprep.subr.bf16.mxu1 %v1342_v43 }
  0x8e   :  { %1136 = vmatprep.mubr.msk.bf16.mxu0 %vm1343_vm0, %v1342_v43  ;;  %1121 = vmatpush3.bf16.msra.mxu0 %v1208_v15 }
  0x8f   :  { %1122 = vmatprep.subr.bf16.mxu0 %v1342_v43 }
  0x90   :  { %1113 = vmatpush3.bf16.msra.mxu1 %v1206_v13 }
  0x91   :  { %1114 = vmatprep.subr.bf16.mxu1 %v1342_v43 }
  0x92   :  { %1123 = vmatpush3.bf16.msra.mxu0 %v1209_v16 }
  0x93   :  { %1124 = vmatprep.subr.bf16.mxu0 %v1342_v43 }
  0x94   :  { %1115 = vmatpush3.bf16.msra.mxu1 %v1207_v14 }
  0x96   :  { %1125 = vmatpush3.bf16.msra.mxu0 %v1210_v17 }
  0x97   :  { %1126 = vmatprep.subr.bf16.mxu0 %v1342_v43 }
  0x9a   :  { %1127 = vmatpush3.bf16.msra.mxu0 %v1211_v18 }
  0x9b   :  { %1128 = vmatprep.subr.bf16.mxu0 %v1342_v43 }
  0x9e   :  { %1129 = vmatpush3.bf16.msra.mxu0 %v1212_v19 }
  0x9f   :  { %1130 = vmatprep.subr.bf16.mxu0 %v1342_v43 }
  0xa2   :  { %1131 = vmatpush3.bf16.msra.mxu0 %v1213_v20 }
  0xa3   :  { %1132 = vmatprep.subr.bf16.mxu0 %v1342_v43 }
  0xa6   :  { %1133 = vmatpush3.bf16.msra.mxu0 %v1214_v56 }
  0xa7   :  { %1134 = vmatprep.subr.bf16.mxu0 %v1342_v43  ;;  %v990_v43 = vld [vmem:[%s1502_s6] ss:$0 sm:$0xff] }
  0xaa   :  { %1135 = vmatpush3.bf16.msra.mxu0 %v1215_v57 }
 0x140   :  { %v1024_v21 = vpop.f32.mrb[0].mxu0 }
 0x141   :  { %v1025_v23 = vpop.f32.mrb[1].mxu0 }
 0x142   :  { %v1026_v24 = vadd.f32 %v1025_v23, %v1024_v21  ;;  %v1027_v25 = vpop.f32.mrb[2].mxu0  ;;  %v1046_v26 = vpop.f32.mrb[0].mxu1 }
 0x143   :  { %v1028_v27 = vpop.f32.mrb[3].mxu0  ;;  %v1047_v30 = vpop.f32.mrb[1].mxu1 }
 0x144   :  { %v542_v28 = vadd.f32 %v1026_v24, %v930_v22  ;;  %v1029_v29 = vadd.f32 %v1028_v27, %v1027_v25  ;;  %v1048_v31 = vadd.f32 %v1047_v30, %v1046_v26  ;;  %v1049_v32 = vpop.f32.mrb[2].mxu1 }
 0x145   :  { %v1050_v34 = vpop.f32.mrb[3].mxu1 }
 0x146   :  { %v545_v33 = vadd.f32 %v1029_v29, %v930_v22  ;;  %v583_v35 = vadd.f32 %v1048_v31, %v542_v28  ;;  %v1051_v36 = vadd.f32 %v1050_v34, %v1049_v32 }
 0x148   :  { %v586_v37 = vadd.f32 %v1051_v36, %v545_v33 }
 0x14a   :  { %v664_v38 = vpop.f32.mrb[4].mxu1 }
 0x14b   :  { %v1098_v39 = vpop.f32.mrb[5].mxu1 }
 0x14c   :  { %v667_v40 = vpop.f32.mrb[6].mxu1 }
 0x14d   :  { %v1099_v41 = vpop.f32.mrb[7].mxu1 }
 0x160   :  { %v1068_v42 = vpop.f32.mrb[4].mxu0 }
 0x161   :  { %v1069_v44 = vpop.f32.mrb[5].mxu0 }
 0x162   :  { %v1070_v45 = vadd.f32 %v1069_v44, %v1068_v42  ;;  %v1071_v46 = vpop.f32.mrb[6].mxu0 }
 0x163   :  { %v1072_v47 = vpop.f32.mrb[7].mxu0 }
 0x164   :  { %v624_v48 = vadd.f32 %v1070_v45, %v583_v35  ;;  %v1073_v49 = vadd.f32 %v1072_v47, %v1071_v46 }
 0x166   :  { %v665_v50 = vadd.f32 %v664_v38, %v624_v48  ;;  %v627_v51 = vadd.f32 %v1073_v49, %v586_v37 }
 0x168   :  { %v668_v52 = vadd.f32 %v667_v40, %v627_v51  ;;  %v671_v53 = vmax.f32 %v665_v50, 0.0 }
 0x16a   :  { %v672_v54 = vmax.f32 %v668_v52, 0.0 }
 0x16c   :  { %v673_v55 = vpack.c.bf16 %v672_v54, %v671_v53 }
 0x16e   :  { %1117 = vmatmul.mubr.bf16.vlgmr.msra.gmra.mrb[8].mxu1 %v673_v55 }
 0x241   :  { %v779_v59 = vpop.f32.mrb[8].mxu1 }
 0x242   :  { %v780_v60 = vadd.f32 %v981_v58, %v779_v59  ;;  %v1118_v61 = vpop.f32.mrb[9].mxu1 }
 0x243   :  { %v782_v62 = vpop.f32.mrb[10].mxu1 }
 0x244   :  { %v783_v63 = vadd.f32 %v981_v58, %v782_v62  ;;  %v1119_v0 = vpop.f32.mrb[11].mxu1  ;;  %v786_v1 = vmax.f32 %v780_v60, 0.0 }
 0x246   :  { %v787_v2 = vmax.f32 %v783_v63, 0.0 }
 0x248   :  { %v788_v3 = vpack.c.bf16 %v787_v2, %v786_v1 }
 0x24a   :  { %1137 = vmatmul.mubr.bf16.vlgmr.msra.gmra.mrb[8].mxu0 %v788_v3 }
 0x31d   :  { %v894_v4 = vpop.f32.mrb[8].mxu0 }
 0x31e   :  { %v1138_v5 = vpop.f32.mrb[9].mxu0  ;;  %v895_v7 = vadd.f32 %v990_v43, %v894_v4 }
 0x31f   :  { %v897_v6 = vpop.f32.mrb[10].mxu0 }
 0x320   :  { %v898_v8 = vadd.f32 %v990_v43, %v897_v6  ;;  %v1139_v9 = vpop.f32.mrb[11].mxu0 }
 0x322   :  { %v1006_v10 = vpack.c.bf16 %v898_v8, %v895_v7 }
 0x324   :  { %1007 = vst [vmem:[#allocation10] sm:$0xff] %v1006_v10  }
 0x325   :  { %915 = vsyncadd [#allocation4], 64  ;;  %s1344_s4 = smov [#allocation10]  }
 0x326   :  { %s916_s10 = sshll.u32 %s1344_s4, 4  ;;  %s917_s10 = int_to_ptr.vmem [resolvable:$true] %s916_s10 }
 0x327   :  { %s1304_s13 = scalar_lea.vmem %s917_s10, 64  ;;  %s1308_s14 = scalar_lea.vmem %s917_s10, 128 }
 0x328   :  { %p1305_p4 = scmp.ne.s32.totalorder %s917_s10, %s1304_s13  ;;  %p1309_p5 = scmp.lt.s32.totalorder %s917_s10, %s917_s10 }
 0x329   :  { %p1310_p6 = scmp.lt.s32.totalorder %s1308_s14, %s1304_s13 }
 0x32b   :  { %p1311_p7 = por %p1310_p6, %p1309_p5 }
 0x32d   :  { %p1312_p8 = pnand %p1311_p7, %p1305_p4 }
 0x32f   :  { %1315 = shalt.err (!%p1312_p8)
}
 0x330   :  { %s1316_s17 = scalar_lea.hbm %s1503_s7, 64 }
 0x331   :  { %p1317_p9 = scmp.ne.s32.totalorder %s1503_s7, %s1316_s17  ;;  %p1320_p10 = scmp.lt.u32.totalorder %s1316_s17, %s1503_s7 }
 0x333   :  { %p1322_p11 = pnand %p1320_p10, %p1317_p9 }
 0x335   :  { %1325 = shalt.err (!%p1322_p11)
}
 0x336   :  { %922 = dma.vmem_to_hbm [thread:$0]  %s917_s10, 64, %s1503_s7, [#allocation4], %s1335_s11, %s1335_s11, %s1336_s12  }
 0x337   :  { %1332 = dma.done.wait [#allocation4], 128  }
 0x338   :  { %1333 = vsyncadd [#allocation4], 4294967168 }
 0x339   :  { %926 = vsyncpa [#allocation3], 1 }
 0x33a   :  { %927 = vsyncpa [#allocation6], 1 }
 0x33b   :  { %928 = vsyncpa [#allocation9], 1 }
 0x33c   :  { %929 = vsyncpa [#allocation4], 1 }

</bundles_post_ra>
